<compile_context>
chip_gen: v7x
topology: tpu7x:2x2x1
jax: 0.10.0
libtpu: 0.0.40
codegen_flags: <defaults>
</compile_context>

<pallas_src>
import functools
import math

import jax
import jax.numpy as jnp
from jax.experimental import pallas as pl
from jax.experimental.pallas import tpu as pltpu


# ---------------------------------------------------------------------------
# Trace-time hardware queries (all failures fall back to safe defaults).
# ---------------------------------------------------------------------------
def _vmem_capacity_bytes():
    try:
        return int(pltpu.get_tpu_info().vmem_capacity_bytes)
    except Exception:
        return 128 * 1024 * 1024            # v5e / v6e physical VMEM


def _mxu_tile_dim():
    try:
        kind = jax.devices()[0].device_kind.lower()
    except Exception:
        return 256
    if any(t in kind for t in ("v2", "v3", "v4", "v5")):
        return 128                          # 4x128^2 MXU generations
    return 256                              # v6e / v7x: 2x256^2 MXU


def _pick_tile(n, prefer, minimum, cap=None):
    """Largest `prefer` candidate <= cap dividing n, else the largest multiple
    of `minimum` (<= min(cap, 512)) dividing n, else n itself (full dim)."""
    cap = n if cap is None else min(cap, n)
    for c in prefer:
        if c <= cap and n % c == 0:
            return c
    if n <= cap and n <= 512 and n % minimum == 0:
        return n
    best = 0
    for m in range(minimum, min(cap, 512) + 1, minimum):
        if n % m == 0:
            best = m
    return best if best else n


# ---------------------------------------------------------------------------
# Kernels.
# ---------------------------------------------------------------------------
def _make_single_kernel(n_k):
    """y = x @ w + b for a single expert, optionally K-tiled (f32 acc)."""
    if n_k == 1:
        def kernel(x_ref, w_ref, b_ref, o_ref):
            y = jnp.dot(x_ref[0], w_ref[...],
                        preferred_element_type=jnp.float32)
            o_ref[0] = (y + b_ref[...].astype(jnp.float32)).astype(o_ref.dtype)
        return kernel

    def kernel(x_ref, w_ref, b_ref, o_ref, acc_ref):
        k = pl.program_id(3)

        @pl.when(k == 0)
        def _():
            acc_ref[...] = jnp.zeros_like(acc_ref)

        acc_ref[...] += jnp.dot(x_ref[0], w_ref[...],
                                preferred_element_type=jnp.float32)

        @pl.when(k == n_k - 1)
        def _():
            o_ref[0] = (acc_ref[...]
                        + b_ref[...].astype(jnp.float32)).astype(o_ref.dtype)

    return kernel


def _make_split_kernel(sp, tm, s_axis, n_k):
    """Rows [0, sp) -> expert A, rows [sp, S) -> expert B (sp, tm static)."""

    if n_k == 1:
        def kernel(x_ref, wa_ref, wb_ref, ba_ref, bb_ref, o_ref):
            row0 = pl.program_id(s_axis) * tm
            x = x_ref[0]

            @pl.when(row0 + tm <= sp)                 # tile entirely expert A
            def _():
                y = jnp.dot(x, wa_ref[...],
                            preferred_element_type=jnp.float32)
                o_ref[0] = (y + ba_ref[...].astype(jnp.float32)
                            ).astype(o_ref.dtype)

            @pl.when(row0 >= sp)                      # tile entirely expert B
            def _():
                y = jnp.dot(x, wb_ref[...],
                            preferred_element_type=jnp.float32)
                o_ref[0] = (y + bb_ref[...].astype(jnp.float32)
                            ).astype(o_ref.dtype)

            @pl.when((row0 < sp) & (row0 + tm > sp))  # single boundary tile
            def _():
                # (tm, 1) row mask; commit the A result before computing B so
                # only one (tm, tn) f32 tile is live at a time.
                in_a = (jax.lax.broadcasted_iota(jnp.int32, (tm, 1), 0)
                        + row0) < sp
                ya = jnp.dot(x, wa_ref[...],
                             preferred_element_type=jnp.float32)
                ya = jnp.where(in_a, ya + ba_ref[...].astype(jnp.float32), 0.0)
                o_ref[0] = ya.astype(o_ref.dtype)
                yb = jnp.dot(x, wb_ref[...],
                             preferred_element_type=jnp.float32)
                yb = jnp.where(in_a, 0.0, yb + bb_ref[...].astype(jnp.float32))
                o_ref[0] = o_ref[0] + yb.astype(o_ref.dtype)

        return kernel

    def kernel(x_ref, wa_ref, wb_ref, ba_ref, bb_ref, o_ref, acc_ref):
        row0 = pl.program_id(s_axis) * tm
        k = pl.program_id(3)
        x = x_ref[0]

        @pl.when(k == 0)
        def _():
            acc_ref[...] = jnp.zeros_like(acc_ref)

        @pl.when(row0 + tm <= sp)                     # tile entirely expert A
        def _():
            acc_ref[...] += jnp.dot(x, wa_ref[...],
                                    preferred_element_type=jnp.float32)

        @pl.when(row0 >= sp)                          # tile entirely expert B
        def _():
            acc_ref[...] += jnp.dot(x, wb_ref[...],
                                    preferred_element_type=jnp.float32)

        @pl.when((row0 < sp) & (row0 + tm > sp))      # single boundary tile
        def _():
            in_a = (jax.lax.broadcasted_iota(jnp.int32, (tm, 1), 0)
                    + row0) < sp
            ya = jnp.dot(x, wa_ref[...], preferred_element_type=jnp.float32)
            acc_ref[...] += jnp.where(in_a, ya, 0.0)  # commit A before B
            yb = jnp.dot(x, wb_ref[...], preferred_element_type=jnp.float32)
            acc_ref[...] += jnp.where(in_a, 0.0, yb)

        @pl.when(k == n_k - 1)
        def _():
            in_a = (jax.lax.broadcasted_iota(jnp.int32, (tm, 1), 0)
                    + row0) < sp
            bias = jnp.where(in_a, ba_ref[...].astype(jnp.float32),
                             bb_ref[...].astype(jnp.float32))
            o_ref[0] = (acc_ref[...] + bias).astype(o_ref.dtype)

    return kernel


# ---------------------------------------------------------------------------
# Wrapper.
# ---------------------------------------------------------------------------
@functools.partial(
    jax.jit, static_argnames=("split_position", "tile_m", "tile_n", "tile_k"))
def multiway_forward(x, wa, ba, wb, bb, *, split_position=-1,
                     tile_m=None, tile_n=None, tile_k=None):
    """Fused MultiwayNetwork(nn.Linear) forward: x [B, S, D] -> [B, S, O].

    Rows [0, split_position) of dim 1 use expert A (wa, ba), the rest use
    expert B (wb, bb).  split_position == -1 routes everything through A,
    0 routes everything through B (matching the PyTorch module).
    """
    B, S, D = x.shape
    O = wa.shape[1]
    if ba.ndim == 1:
        ba = ba[None, :]
    if bb.ndim == 1:
        bb = bb[None, :]

    # ---- static split position -------------------------------------------
    if split_position == -1:
        sp = S
    elif 0 <= split_position <= S:
        sp = split_position
    else:
        raise ValueError(
            f"split_position={split_position} invalid for seq length {S} "
            "(must be -1 or in [0, S]).")
    single_expert = sp in (0, S)
    n_w = 1 if single_expert else 2

    # ---- dtype / generation aware sizing ----------------------------------
    x_isz = jnp.dtype(x.dtype).itemsize
    w_isz = jnp.dtype(wa.dtype).itemsize
    sublane_min = {4: 8, 2: 16, 1: 32}[x_isz]       # packed sublane tile
    mxu = _mxu_tile_dim()                           # 128 (<=v5), 256 (v6e/v7x)
    prefer_mn = tuple(dict.fromkeys((2 * mxu, mxu, 128)))
    vmem_cap = _vmem_capacity_bytes()               # 64 MiB v7x, 128 MiB else
    budget = vmem_cap - (16 << 20)                  # ~48 MiB / ~112 MiB

    # ---- K (contraction) tile ---------------------------------------------
    if tile_k is not None:
        tk = tile_k
        if D % tk or (tk != D and tk % 128):
            raise ValueError("tile_k must divide D and be a multiple of 128.")
    elif D >= 2048:
        tk = _pick_tile(D, (1024, 512, 256), 128)   # decouple footprint from D
    else:
        tk = D

    # ---- N (output feature) tile ------------------------------------------
    if tile_n is not None:
        tn = tile_n
        if O % tn or (tn != O and tn % 128):
            raise ValueError("tile_n must divide O and be a multiple of 128.")
    else:
        tn = _pick_tile(O, prefer_mn, 128)
        # TODO(synk): pad O < 128 outputs to a full lane instead of accepting
        # masked vst.msk stores.

    # ---- M (sequence) tile: keep the split on a tile edge if possible -----
    if tile_m is not None:
        tm = tile_m
        if S % tm or (tm != S and tm % sublane_min):
            raise ValueError(
                f"tile_m must divide S and be a multiple of {sublane_min} "
                f"for dtype {x.dtype}.")
    elif single_expert:
        tm = _pick_tile(S, prefer_mn, sublane_min)
    else:
        g = math.gcd(sp, S - sp)
        cap = max(sublane_min, (S // 8) // sublane_min * sublane_min)
        tm_aligned = (_pick_tile(g, prefer_mn, sublane_min)
                      if g % sublane_min == 0 else 0)
        if tm_aligned >= min(128, cap):
            tm = tm_aligned          # boundary lands on a tile edge
        else:
            # Unalignable (or alignment forces tiny tiles): cap tm so at most
            # ~1/8 of the tiles pay the double matmul.
            tm = _pick_tile(S, prefer_mn, sublane_min, cap=cap)
            # TODO(synk): mask boundary rows with a cdiv grid for pathological
            # S with no aligned divisors instead of falling back to tm = S.

    # ---- fit the working set inside this generation's VMEM ----------------
    def _footprint(tm_, tn_, tk_):
        fb = 2 * tm_ * tk_ * x_isz                       # x tile (double buf)
        fb += 2 * n_w * (tk_ * tn_ + tn_) * w_isz        # weights + bias
        fb += 2 * tm_ * tn_ * x_isz                      # output tile
        if D // tk_ > 1:
            fb += tm_ * tn_ * 4                          # f32 accumulator
        return fb + (2 << 20)                            # compiler slack

    for _ in range(16):
        if _footprint(tm, tn, tk) <= budget:
            break
        if tk == D and D > 512 and D % 128 == 0 and tile_k is None:
            cand = _pick_tile(D, (1024, 512, 256), 128)  # enable K tiling
            if cand != D:
                tk = cand
                continue
        if tn > 128 and tn % 2 == 0 and O % (tn // 2) == 0 and tile_n is None:
            tn //= 2
            continue
        if (tk > 128 and tk % 2 == 0 and D % (tk // 2) == 0
                and (tk // 2) % 128 == 0 and tile_k is None):
            tk //= 2
            continue
        if (tm > sublane_min and tm % 2 == 0 and S % (tm // 2) == 0
                and (tm // 2) % sublane_min == 0 and tile_m is None):
            tm //= 2
            continue
        break

    # Grow tn within budget: fewer n-tiles => fewer full re-reads of x.
    if tile_n is None:
        while (tn < min(O, 2048) and O % (tn * 2) == 0
               and _footprint(tm, tn * 2, tk) <= budget):
            tn *= 2

    n_s, n_n, n_k = S // tm, O // tn, D // tk

    # Megacore (v7x): keep at least one parallel axis of extent >= 2.
    if (single_expert and tile_m is None and n_n * B * n_s == 1
            and tm % 2 == 0 and (tm // 2) % sublane_min == 0
            and S % (tm // 2) == 0):
        tm //= 2
        n_s = S // tm

    # ---- grid order: keep the larger operand resident ----------------------
    w_bytes = n_w * (D * O + O) * w_isz
    x_bytes = B * S * D * x_isz
    out_bytes = B * S * O * x_isz
    if n_k > 1:
        order = "wr"                        # (n, b, s, k); reduction innermost
        hbm_bytes = n_n * x_bytes + B * n_s * w_bytes + out_bytes
    elif w_bytes + n_n * x_bytes <= x_bytes + B * n_s * w_bytes:
        order = "wr"                        # weights resident across (b, s)
        hbm_bytes = w_bytes + n_n * x_bytes + out_bytes
    else:
        order = "xr"                        # x resident across the n sweep
        hbm_bytes = x_bytes + B * n_s * w_bytes + out_bytes

    flops = 2 * B * S * D * O
    if not single_expert and sp % tm != 0:
        flops += 2 * B * tm * D * O         # boundary strip runs both experts
    cost = pl.CostEstimate(flops=flops, transcendentals=0,
                           bytes_accessed=hbm_bytes)

    # Always set the scoped-VMEM limit (v5e defaults to 16 MiB, v6e/v7x to
    # 32 MiB); clamp to this generation's physical budget.
    vmem_limit = int(min(budget, max(_footprint(tm, tn, tk), 32 << 20)))
    if n_k > 1:
        semantics = ("parallel", "parallel", "parallel", "arbitrary")
    else:
        semantics = ("parallel", "parallel", "parallel")
    compiler_params = pltpu.CompilerParams(
        dimension_semantics=semantics, vmem_limit_bytes=vmem_limit)

    # ---- BlockSpecs ---------------------------------------------------------
    if n_k > 1:
        grid = (n_n, B, n_s, n_k)
        s_axis = 2
        x_spec = pl.BlockSpec((1, tm, tk), lambda n, b, s, k: (b, s, k))
        w_spec = pl.BlockSpec((tk, tn), lambda n, b, s, k: (k, n))
        b_spec = pl.BlockSpec((1, tn), lambda n, b, s, k: (0, n))
        o_spec = pl.BlockSpec((1, tm, tn), lambda n, b, s, k: (b, s, n))
        scratch = [pltpu.VMEM((tm, tn), jnp.float32)]
    elif order == "wr":
        grid = (n_n, B, n_s)
        s_axis = 2
        x_spec = pl.BlockSpec((1, tm, D), lambda n, b, s: (b, s, 0))
        # Weights only change on the outermost axis; single-buffer them when
        # the tile is big enough for the VMEM saving to matter (the one-DMA
        # refill bubble is amortized over B * n_s inner steps).
        w_mode = ({"pipeline_mode": pl.Buffered(1)}
                  if D * tn * w_isz >= (1 << 20) else {})
        w_spec = pl.BlockSpec((D, tn), lambda n, b, s: (0, n), **w_mode)
        b_spec = pl.BlockSpec((1, tn), lambda n, b, s: (0, n))
        o_spec = pl.BlockSpec((1, tm, tn), lambda n, b, s: (b, s, n))
        scratch = []
    else:  # "xr": x stays resident across the innermost n sweep
        grid = (B, n_s, n_n)
        s_axis = 1
        x_spec = pl.BlockSpec((1, tm, D), lambda b, s, n: (b, s, 0))
        w_spec = pl.BlockSpec((D, tn), lambda b, s, n: (0, n))
        b_spec = pl.BlockSpec((1, tn), lambda b, s, n: (0, n))
        o_spec = pl.BlockSpec((1, tm, tn), lambda b, s, n: (b, s, n))
        scratch = []

    out_shape = jax.ShapeDtypeStruct((B, S, O), x.dtype)

    if single_expert:
        w, bias = (wa, ba) if sp == S else (wb, bb)
        kernel = _make_single_kernel(n_k)
        in_specs = [x_spec, w_spec, b_spec]
        operands = (x, w, bias)
    else:
        kernel = _make_split_kernel(sp, tm, s_axis, n_k)
        in_specs = [x_spec, w_spec, w_spec, b_spec, b_spec]
        operands = (x, wa, wb, ba, bb)

    grid_spec = pltpu.PrefetchScalarGridSpec(
        num_scalar_prefetch=0, grid=grid, in_specs=in_specs,
        out_specs=o_spec, scratch_shapes=scratch)

    return pl.pallas_call(
        kernel, out_shape=out_shape, grid_spec=grid_spec,
        compiler_params=compiler_params, cost_estimate=cost)(*operands)


# ---------------------------------------------------------------------------
# Pure-JAX reference mirroring the PyTorch module.
# ---------------------------------------------------------------------------
def _reference(x, wa, ba, wb, bb, split_position):
    lin_a = lambda v: v @ wa + ba.reshape(-1)
    lin_b = lambda v: v @ wb + bb.reshape(-1)
    if split_position == -1:
        return lin_a(x)
    if split_position == 0:
        return lin_b(x)
    return jnp.concatenate(
        [lin_a(x[:, :split_position, :]), lin_b(x[:, split_position:, :])],
        axis=1)


if __name__ == "__main__":
    root = jax.random.PRNGKey(0)

    def make_case(key, B, S, D, O, dtype=jnp.float32):
        kx, kwa, kba, kwb, kbb = jax.random.split(key, 5)
        x = jax.random.normal(kx, (B, S, D), dtype=dtype)
        # nn.Linear weight is (O, D); we store the transposed (D, O) layout.
        wa = jax.random.normal(kwa, (D, O), dtype=dtype) * 0.05
        ba = jax.random.normal(kba, (1, O), dtype=dtype) * 0.05
        wb = jax.random.normal(kwb, (D, O), dtype=dtype) * 0.05
        bb = jax.random.normal(kbb, (1, O), dtype=dtype) * 0.05
        return x, wa, ba, wb, bb

    def check(args, sp, **kw):
        y = jax.block_until_ready(
            multiway_forward(*args, split_position=sp, **kw))
        y_ref = _reference(*args, sp)
        return bool(jnp.allclose(y, y_ref, atol=1e-4, rtol=1e-4))

    k1, k2, k3 = jax.random.split(root, 3)
    ok = True

    # Case 1: non-K-tiled, weights-resident path.  Exercises single-expert
    # (-1, 0, S), tile-aligned mid splits (8, 16) and unaligned splits with a
    # boundary tile (3, 12), plus an explicit user tile.
    c1 = make_case(k1, B=2, S=32, D=64, O=128)
    for sp in (-1, 0, 3, 8, 12, 16, 32):
        ok &= check(c1, sp)
    ok &= check(c1, 12, tile_m=8)

    # Case 2: K-tiled path (explicit tile_k so the small demo D exercises the
    # reduction axis + f32 accumulator), with and without a boundary tile.
    c2 = make_case(k2, B=2, S=32, D=256, O=128)
    for sp in (-1, 12, 16):
        ok &= check(c2, sp, tile_k=128)

    # Case 3: x-resident grid order (weights are the re-streamed operand).
    c3 = make_case(k3, B=1, S=32, D=64, O=256)
    ok &= check(c3, -1, tile_n=128)

    # Out-of-range split positions must be rejected (matches torch.split).
    try:
        multiway_forward(*c1, split_position=-2)
        ok = False
    except ValueError:
        pass

    print("KERNEL_OK" if ok else "KERNEL_MISMATCH")
</pallas_src>

<mosaic_0001>
module attributes {stable_mosaic.version = 11 : i64} {
  func.func @kernel(%arg0: i32, %arg1: i32, %arg2: i32, %arg3: memref<1x32x64xf32, #tpu.memory_space<vmem>>, %arg4: memref<64x128xf32, #tpu.memory_space<vmem>>, %arg5: memref<1x128xf32, #tpu.memory_space<vmem>>, %arg6: memref<1x32x128xf32, #tpu.memory_space<vmem>>) attributes {dimension_semantics = [#tpu.dimension_semantics<parallel>, #tpu.dimension_semantics<parallel>, #tpu.dimension_semantics<parallel>], iteration_bounds = array<i64: 1, 2, 1>, scalar_prefetch = 0 : i64, scratch_operands = 0 : i64, tpu.core_type = #tpu.core_type<tc>, window_params = [{transform_indices = @transform_0, window_bounds = array<i64: 1, 32, 64>}, {transform_indices = @transform_1, window_bounds = array<i64: 64, 128>}, {transform_indices = @transform_2, window_bounds = array<i64: 1, 128>}, {transform_indices = @transform_3, window_bounds = array<i64: 1, 32, 128>}]} {
    %c0 = arith.constant 0 : index
    %c0_0 = arith.constant 0 : index
    %c0_1 = arith.constant 0 : index
    %0 = vector.load %arg3[%c0, %c0_0, %c0_1] : memref<1x32x64xf32, #tpu.memory_space<vmem>>, vector<1x32x64xf32>
    %1 = vector.shape_cast %0 : vector<1x32x64xf32> to vector<32x64xf32>
    %c0_2 = arith.constant 0 : index
    %c0_3 = arith.constant 0 : index
    %2 = vector.load %arg4[%c0_2, %c0_3] : memref<64x128xf32, #tpu.memory_space<vmem>>, vector<64x128xf32>
    %cst = arith.constant dense<0.000000e+00> : vector<32x128xf32>
    %3 = tpu.matmul %1, %2, %cst {dimension_numbers = #tpu.dot_dimension_numbers<[1], [0], [0], [1], [0, 0, 1, 1], [], []>} : vector<32x64xf32>, vector<64x128xf32>, vector<32x128xf32> -> vector<32x128xf32>
    %c0_4 = arith.constant 0 : index
    %c0_5 = arith.constant 0 : index
    %4 = vector.load %arg5[%c0_4, %c0_5] : memref<1x128xf32, #tpu.memory_space<vmem>>, vector<1x128xf32>
    %5 = vector.broadcast %4 : vector<1x128xf32> to vector<32x128xf32>
    %6 = arith.addf %3, %5 : vector<32x128xf32>
    %c0_6 = arith.constant 0 : index
    %c0_7 = arith.constant 0 : index
    %c0_8 = arith.constant 0 : index
    %7 = vector.load %arg6[%c0_6, %c0_7, %c0_8] : memref<1x32x128xf32, #tpu.memory_space<vmem>>, vector<1x32x128xf32>
    %8 = vector.shape_cast %7 : vector<1x32x128xf32> to vector<32x128xf32>
    %9 = vector.shape_cast %6 : vector<32x128xf32> to vector<1x32x128xf32>
    tpu.vector_store %arg6[%c0_6, %c0_7, %c0_8], %9 {strides = array<i32>} : memref<1x32x128xf32, #tpu.memory_space<vmem>>, vector<1x32x128xf32>,
    return
  }
  func.func @transform_0(%arg0: i32, %arg1: i32, %arg2: i32) -> (i32, i32, i32) {
    %c0_i32 = arith.constant 0 : i32
    %c0_i32_0 = arith.constant 0 : i32
    return %arg1, %arg2, %c0_i32 : i32, i32, i32
  }
  func.func @transform_1(%arg0: i32, %arg1: i32, %arg2: i32) -> (i32, i32) {
    %c0_i32 = arith.constant 0 : i32
    %c0_i32_0 = arith.constant 0 : i32
    return %c0_i32, %arg0 : i32, i32
  }
  func.func @transform_2(%arg0: i32, %arg1: i32, %arg2: i32) -> (i32, i32) {
    %c0_i32 = arith.constant 0 : i32
    %c0_i32_0 = arith.constant 0 : i32
    return %c0_i32, %arg0 : i32, i32
  }
  func.func @transform_3(%arg0: i32, %arg1: i32, %arg2: i32) -> (i32, i32, i32) {
    %c0_i32 = arith.constant 0 : i32
    return %arg1, %arg2, %arg0 : i32, i32, i32
  }
}

</mosaic_0001>

<bundles_post_ra>
// kernel: multiway_forward.1
= control target key start
LH: loop header
LB: loop body
LE: loop exit
PB: predicated region body
PF: predicated region fallthrough
CT: control target
= control target key end

     0   :  { %8 = vsyncpa [#allocation3], 0  ;;  %s1082_s0 = inlined_call_operand.hbm [shape: f32[2,32,64], index: 0, kind: input, shape index: {}]   ;;  %s1083_s1 = inlined_call_operand.hbm [shape: f32[64,128], index: 1, kind: input, shape index: {}]   ;;  %s1084_s2 = inlined_call_operand.vmem [shape: f32[1,128], index: 2, kind: input, shape index: {}]   ;;  %s1085_s3 = inlined_call_operand.hbm [shape: f32[2,32,128], index: 3, kind: output, shape index: {}]  }
   0x1   :  { %10 = vsyncpa [#allocation3 + $0x1], 0 }
   0x2   :  { %11 = vsyncpa [#allocation6], 0 }
   0x3   :  { %12 = vsyncpa [#allocation4], 0 }
   0x4   :  { %14 = vsyncpa [#allocation4 + $0x1], 0  ;;  %s840_s12 = smov 0   ;;  %s842_s13 = smov 0  }
   0x5   :  { %s844_s14 = smov 0   ;;  %s846_s15 = smov 0  }
   0x6   :  { %s848_s16 = smov 0   ;;  %s850_s17 = smov 0  }
   0x7 LB: > { %s507_s18 = sadd.s32 4294967295, %s811_s17   ;;  %s508_s19 = sadd.s32 4294967294, %s811_s17   ;;  %s811_s17 = sphi %s850_s17, %s20_s17   ;;  %s807_s16 = sphi %s848_s16, %s1109_s16   ;;  %s803_s15 = sphi %s846_s15, %s1108_s15   ;;  %s799_s14 = sphi %s844_s14, %s1107_s14   ;;  %s795_s13 = sphi %s842_s13, %s1106_s13   ;;  %s791_s12 = sphi %s840_s12, %s1105_s12  }
   0x8   : > { %p61_p0 = scmp.ne.s32.totalorder %s795_s13, %s791_s12  ;;  %p874_p1 = scmp.eq.s32.totalorder %s507_s18, 0 }
   0x9   : > { %p878_p2 = scmp.eq.s32.totalorder %s507_s18, 1  ;;  %p147_p3 = scmp.eq.s32.totalorder %s508_s19, 1 }
   0xa   : > { %s1090_s20 = scalar_select %p874_p1, 1, 0 }
   0xb   : > { %s1091_s21 = scalar_select %p878_p2, 1, 0 }
   0xc   : > { %p884_p4 = por %p874_p1, %p61_p0  ;;  %p509_p5 = scmp.ge.s32.totalorder %s811_s17, 1 }
   0xd   : > { %p889_p6 = por %p147_p3, %p61_p0  ;;  %p154_p7 = scmp.lt.s32.totalorder %s811_s17, 3 }
   0xe   : > { %s1092_s22 = scalar_select %p884_p4, 1, 0 }
   0xf   : > { %s1093_s23 = scalar_select %p889_p6, 1, 0 }
  0x10   : > { %p894_p8 = pnand %p509_p5, %p154_p7  ;;  %s813_s25 = smov [#allocation5]  }
  0x11   : > { %s168_s26 = sshll.u32 %s813_s25, 4  ;;  %s35_s28 = sadd.s32 1, %s807_s16  ;;  %s169_s26 = int_to_ptr.vmem [resolvable:$true] %s168_s26 }
  0x12   : > { %s1094_s24 = scalar_select %p894_p8, 1, 0 }
  0x13   : > { %p598_p9 = pneg %p894_p8  ;;  %s667_s4 = scalar_lea.hbm %s1083_s1, 1024 }
  0x14   : > { %p668_p12 = scmp.ne.s32.totalorder %s1083_s1, %s667_s4  ;;  %p674_p5 = scmp.lt.u32.totalorder %s667_s4, %s1083_s1 }
  0x15   : > { %p903_p11 = pnand %p598_p9, %p874_p1 }
  0x17   : > { %p669_p13 = pneg %p903_p11 }
  0x19   : > { %p670_p0 = pnand %p669_p13, %p668_p12 }
  0x1b   : > { %p671_p3 = pneg %p670_p0 }
  0x1d   : > { %p676_p7 = pnand %p674_p5, %p671_p3 }
  0x1f   : > { %679 = shalt.err (!%p676_p7)
}
  0x20   : > { %s680_s9 = scalar_lea.vmem %s169_s26, 1024  ;;  %p688_p1 = scmp.lt.s32.totalorder %s169_s26, %s169_s26 }
  0x21   : > { %p681_p9 = scmp.ne.s32.totalorder %s169_s26, %s680_s9  ;;  %p689_p4 = scmp.lt.s32.totalorder %s680_s9, %s680_s9 }
  0x23   : > { %p683_p10 = pnand %p681_p9, %p669_p13  ;;  %p690_p8 = por %p689_p4, %p688_p1 }
  0x25   : > { %p684_p6 = pneg %p683_p10 }
  0x27   : > { %p691_p2 = pnand %p690_p8, %p684_p6 }
  0x29   : > { %694 = shalt.err (!%p691_p2)
}
  0x2a   : > { %s814_s10 = smov 128   ;;  %s815_s11 = smov 8  }
  0x2b   : > { %601 = dma.hbm_to_vmem [thread:$0]  (!%p903_p11), %s1083_s1, 1024, %s169_s26, [#allocation6], %s814_s10, %s814_s10, %s815_s11  }
  0x2c   : > { %p37_p1 = scmp.ge.s32.totalorder %s35_s28, 2  ;;  %s48_s25 = sadd.s32 1, %s799_s14 }
  0x2d   : > { %p55_p2 = scmp.ne.s32.totalorder %s799_s14, %s795_s13  ;;  %p56_p4 = scmp.eq.s32.totalorder %s811_s17, 0 }
  0x2e   : > { %s1111_s28 = smov (%p37_p1, %s35_s28), 0  ;;  %p1097_p8 = scmp.ne.s32.totalorder %s1091_s21, 0 }
  0x2f   : > { %p933_p6 = por %p56_p4, %p55_p2  ;;  %s43_s30 = ssub.s32 %s807_s16, %s1111_s28 }
  0x30   : > { %p939_p10 = por %p1097_p8, %p55_p2  ;;  %p611_p12 = scmp.lt.s32.totalorder %s811_s17, 2 }
  0x31   : > { %p46_p11 = scmp.eq.s32.totalorder %s43_s30, 0  ;;  %s188_s26 = sand.u32 1, %s799_s14  }
  0x32   : > { %s513_s4 = sshll.u32 %s188_s26, 5  ;;  %s530_s6 = sshll.u32 %s807_s16, 9 }
  0x33   : > { %s948_s5 = scalar_select %p46_p11, %s799_s14, %s48_s25  }
  0x34   : > { %s954_s9 = scalar_lea.hbm %s1082_s0, %s530_s6  ;;  %s192_s21 = scalar_lea.vmem [#allocation2], %s513_s4 }
  0x35   : > { %s201_s18 = sshll.u32 %s192_s21, 4  ;;  %p960_p13 = pnand %p611_p12, %p933_p6  ;;  %s956_s18 = int_to_ptr.vmem [resolvable:$true] %s201_s18 }
  0x36   : > { %s964_s25 = scalar_lea.sflag [#allocation3], %s188_s26  ;;  %s695_s30 = scalar_lea.hbm %s954_s9, 512 }
  0x37   : > { %p696_p0 = scmp.ne.s32.totalorder %s954_s9, %s695_s30  ;;  %p697_p3 = pneg %p960_p13 }
  0x38   : > { %s700_s29 = scalar_lea.hbm %s1082_s0, 1024  ;;  %p701_p9 = scmp.lt.u32.totalorder %s954_s9, %s1082_s0 }
  0x39   : > { %p698_p5 = pnand %p697_p3, %p696_p0  ;;  %p702_p1 = scmp.lt.u32.totalorder %s700_s29, %s695_s30 }
  0x3a   : > { %p704_p4 = scmp.lt.u32.totalorder %s695_s30, %s954_s9 }
  0x3b   : > { %p699_p7 = pneg %p698_p5  ;;  %p703_p2 = por %p702_p1, %p701_p9 }
  0x3d   : > { %p705_p6 = por %p704_p4, %p703_p2 }
  0x3f   : > { %p706_p8 = pnand %p705_p6, %p699_p7 }
  0x41   : > { %709 = shalt.err (!%p706_p8)
}
  0x42   : > { %s710_s26 = scalar_lea.vmem %s956_s18, 512  ;;  %s816_s21 = smov [#allocation2]  }
  0x43   : > { %p711_p12 = scmp.ne.s32.totalorder %s956_s18, %s710_s26  ;;  %s715_s4 = sshll.u32 %s816_s21, 4  ;;  %s716_s4 = int_to_ptr.vmem [resolvable:$false] %s715_s4 }
  0x44   : > { %s717_s6 = scalar_lea.vmem %s716_s4, 1024  ;;  %p718_p5 = scmp.lt.s32.totalorder %s956_s18, %s716_s4 }
  0x45   : > { %p713_p11 = pnand %p711_p12, %p697_p3  ;;  %p719_p9 = scmp.lt.s32.totalorder %s717_s6, %s710_s26 }
  0x47   : > { %p714_p0 = pneg %p713_p11  ;;  %p720_p1 = por %p719_p9, %p718_p5 }
  0x49   : > { %p721_p2 = pnand %p720_p1, %p714_p0 }
  0x4b   : > { %724 = shalt.err (!%p721_p2)
}
  0x4c   : > { %605 = dma.hbm_to_vmem [thread:$0]  (!%p960_p13), %s954_s9, 512, %s956_s18, %s964_s25, %s814_s10, %s814_s10, %s815_s11  }
  0x4d   : > { %p1100_p3 = scmp.ne.s32.totalorder %s1094_s24, 0 }
  0x4e   : > { %s998_s30 = sand.u32 (!%p1100_p3), 1, %s795_s13   ;;  %p1101_p7 = scmp.ne.s32.totalorder (!%p1100_p3), %s1092_s22, 0 }
  0x4f   : > { %213 = sbr.rel (%p1100_p3) target bundleno = 339 (0x153), region = 32  ;;  %s517_s29 = sshll.u32 (!%p1100_p3), %s998_s30, 5 }
  0x50   : > { %s216_s7 = scalar_lea.sflag (!%p1100_p3), [#allocation3], %s998_s30  ;;  %s1004_s19 = scalar_lea.vmem (!%p1100_p3), [#allocation2], %s517_s29 }
  0x56   : > { %778 = dma.done.wait (%p1101_p7), %s216_s7, 512  }
  0x57   : > { %780 = vsyncadd (%p1101_p7), %s216_s7, 4294966784  ;;  %p1102_p13 = scmp.ne.s32.totalorder %s1090_s20, 0 }
  0x59   : > { %782 = dma.done.wait (%p1102_p13), [#allocation6], 1024  }
  0x5a   : > { %784 = vsyncadd (%p1102_p13), [#allocation6], 4294966272  ;;  %v258_v0 = vld [vmem:[#allocation5] sm:$0xff]  ;;  %v259_v1 = vld [vmem:[#allocation5 + $0x8] sm:$0xff]  ;;  %vm273_vm0 = vcmask 523264   ;;  %s248_s20 = scalar_lea.vmem [#allocation7], %s517_s29 }
  0x5b   : > { %v260_v2 = vld [vmem:[#allocation5 + $0x10] sm:$0xff]  ;;  %v566_v3 = vpack.c.bf16 %v259_v1, %v258_v0  ;;  %v261_v4 = vld [vmem:[#allocation5 + $0x18] sm:$0xff]  ;;  %v262_v6 = vld [vmem:[#allocation5 + $0x20] sm:$0xff]  ;;  %s392_s22 = sshll.u32 %s248_s20, 4  ;;  %s531_s11 = sshll.u32 %s803_s15, 9  ;;  %s1028_s22 = int_to_ptr.vmem [resolvable:$true] %s392_s22 }
  0x5c   : > { %v570_v5 = vpack.c.bf16 %v261_v4, %v260_v2  ;;  %v263_v7 = vld [vmem:[#allocation5 + $0x28] sm:$0xff]  ;;  %v254_v8 = vld [vmem:[%s1004_s19] sm:$0xff]  ;;  %v256_v9 = vld [vmem:[%s1004_s19 + $0x10] sm:$0xff]  ;;  %s1033_s25 = scalar_lea.hbm %s1085_s3, %s531_s11  ;;  %s376_s15 = scalar_lea.sflag [#allocation4], %s998_s30 }
  0x5d   : > { %567 = vmatprep.subr.bf16.mxu0 %v566_v3  ;;  %582 = vmatprep.subr.bf16.mxu1 %v566_v3  ;;  %v574_v10 = vpack.c.bf16 %v263_v7, %v262_v6  ;;  %v264_v11 = vld [vmem:[#allocation5 + $0x30] sm:$0xff]  ;;  %v265_v12 = vld [vmem:[#allocation5 + $0x38] sm:$0xff]  ;;  %v255_v14 = vld [vmem:[%s1004_s19 + $0x8] sm:$0xff]  ;;  %s725_s8 = scalar_lea.vmem %s1028_s22, 512  ;;  %s817_s26 = smov [#allocation7]  }
  0x5e   : > { %569 = vmatpush3.bf16.msra.mxu0 %v566_v3  ;;  %586 = vmatpush3.bf16.msra.mxu1 %v566_v3  ;;  %v578_v13 = vpack.c.bf16 %v265_v12, %v264_v11  ;;  %v257_v15 = vld [vmem:[%s1004_s19 + $0x18] sm:$0xff]  ;;  %v520_v16 = vld [vmem:[%s1084_s2] ss:$0 sm:$0xff]  ;;  %p726_p4 = scmp.ne.s32.totalorder %s1028_s22, %s725_s8  ;;  %s729_s21 = sshll.u32 %s817_s26, 4  ;;  %s730_s21 = int_to_ptr.vmem [resolvable:$false] %s729_s21 }
  0x5f   : > { %571 = vmatprep.subr.bf16.mxu0 %v570_v5  ;;  %583 = vmatprep.subr.bf16.mxu1 %v570_v5  ;;  %s731_s4 = scalar_lea.vmem %s730_s21, 1024  ;;  %p732_p12 = scmp.lt.s32.totalorder %s1028_s22, %s730_s21 }
  0x60   : > { %560 = vmatprep.mubr.msk.f32.mxu0 %vm273_vm0, %v254_v8  ;;  %563 = vmatprep.mubr.msk.f32.mxu1 %vm273_vm0, %v256_v9  ;;  %p727_p6 = pnand %p726_p4, %p939_p10  ;;  %p733_p11 = scmp.lt.s32.totalorder %s731_s4, %s725_s8 }
  0x62   : > { %573 = vmatpush3.bf16.msra.mxu0 %v570_v5  ;;  %587 = vmatpush3.bf16.msra.mxu1 %v570_v5  ;;  %p728_p8 = pneg %p727_p6  ;;  %p734_p0 = por %p733_p11, %p732_p12 }
  0x63   : > { %575 = vmatprep.subr.bf16.mxu0 %v574_v10  ;;  %584 = vmatprep.subr.bf16.mxu1 %v574_v10 }
  0x64   : > { %p735_p5 = pnand %p734_p0, %p728_p8 }
  0x66   : > { %577 = vmatpush3.bf16.msra.mxu0 %v574_v10  ;;  %588 = vmatpush3.bf16.msra.mxu1 %v574_v10 }
  0x67   : > { %579 = vmatprep.subr.bf16.mxu0 %v578_v13  ;;  %585 = vmatprep.subr.bf16.mxu1 %v578_v13 }
  0x6a   : > { %581 = vmatpush3.bf16.msra.mxu0 %v578_v13  ;;  %589 = vmatpush3.bf16.msra.mxu1 %v578_v13 }
  0x6d   : > { %561 = vmatmul.mubr.msk.f32.vlgmr.msra.gmra.mrb[0].mxu0 %vm273_vm0, %v255_v14  ;;  %564 = vmatmul.mubr.msk.f32.vlgmr.msra.gmra.mrb[0].mxu1 %vm273_vm0, %v257_v15 }
 0x140   : > { %v562_v17 = vpop.f32.mrb[0].mxu0  ;;  %v565_v18 = vpop.f32.mrb[0].mxu1 }
 0x141   : > { %v358_v19 = vadd.f32 %v562_v17, %v520_v16  ;;  %v368_v20 = vadd.f32 %v565_v18, %v520_v16  ;;  %v352_v21 = vpop.f32.mrb[1].mxu0  ;;  %v362_v22 = vpop.f32.mrb[1].mxu1 }
 0x142   : > { %v353_v23 = vadd.f32 %v520_v16, %v352_v21  ;;  %v363_v24 = vadd.f32 %v520_v16, %v362_v22 }
 0x143   : > { %372 = vst [vmem:[%s248_s20 + $0x8] sm:$0xff] %v358_v19  ;;  %374 = vst [vmem:[%s248_s20 + $0x18] sm:$0xff] %v368_v20 }
 0x144   : > { %371 = vst [vmem:[%s248_s20] sm:$0xff] %v353_v23  ;;  %373 = vst [vmem:[%s248_s20 + $0x10] sm:$0xff] %v363_v24 }
 0x145   : > { %738 = shalt.err (!%p735_p5)
}
 0x146   : > { %s739_s6 = scalar_lea.hbm %s1033_s25, 512  ;;  %s743_s19 = scalar_lea.hbm %s1085_s3, 1024 }
 0x147   : > { %p740_p9 = scmp.ne.s32.totalorder %s1033_s25, %s739_s6  ;;  %p744_p3 = scmp.lt.u32.totalorder %s1033_s25, %s1085_s3 }
 0x148   : > { %p745_p7 = scmp.lt.u32.totalorder %s743_s19, %s739_s6  ;;  %p747_p4 = scmp.lt.u32.totalorder %s739_s6, %s1033_s25 }
 0x149   : > { %p741_p1 = pnand %p740_p9, %p939_p10 }
 0x14a   : > { %p746_p13 = por %p745_p7, %p744_p3 }
 0x14b   : > { %p742_p2 = pneg %p741_p1 }
 0x14c   : > { %p748_p6 = por %p747_p4, %p746_p13 }
 0x14e   : > { %p749_p8 = pnand %p748_p6, %p742_p2 }
 0x150   : > { %752 = shalt.err (!%p749_p8)
}
 0x151   : > { %s818_s10 = smov 128   ;;  %s819_s11 = smov 8  }
 0x152   : > { %596 = dma.vmem_to_hbm [thread:$0]  (%p939_p10), %s1028_s22, 512, %s1033_s25, %s376_s15, %s818_s10, %s818_s10, %s819_s11  }
 0x153 PF: > { %s407_s9 = sand.u32 1, %s791_s12   ;;  %p1103_p12 = scmp.ne.s32.totalorder %s1093_s23, 0 }
 0x154   : > { %p1104_p11 = scmp.ge.s32.totalorder %s811_s17, 2  ;;  %s408_s18 = scalar_lea.sflag [#allocation4], %s407_s9 }
 0x156   : > { %p607_p0 = pnand %p1104_p11, %p1103_p12 }
 0x158   : > { %786 = dma.done.wait (!%p607_p0), %s408_s18, 512  }
 0x159   : > { %788 = vsyncadd (!%p607_p0), %s408_s18, 4294966784  ;;  %s20_s17 = sadd.s32 1, %s811_s17   ;;  %s1105_s12 = smov %s795_s13 }
 0x15a   : > { %p17_p5 = scmp.ge.s32.totalorder %s20_s17, 4   ;;  %s1106_s13 = smov %s799_s14 }
 0x15b   : > { %s1107_s14 = smov %s948_s5  ;;  %s1108_s15 = smov %s807_s16 }
 0x15c   : > { %s1109_s16 = smov %s1111_s28  ;;  %19 = sbr.rel (!%p17_p5) target bundleno = 7 (0x7), region = 85 }
 0x163   :  { %413 = vsyncpa [#allocation3], 1 }
 0x164   :  { %415 = vsyncpa [#allocation3 + $0x1], 1 }
 0x165   :  { %416 = vsyncpa [#allocation6], 1 }
 0x166   :  { %417 = vsyncpa [#allocation4], 1 }
 0x167   :  { %419 = vsyncpa [#allocation4 + $0x1], 1 }

</bundles_post_ra>
